<compile_context>
chip_gen: v7x
topology: tpu7x:2x2x1
jax: 0.10.0
libtpu: 0.0.40
codegen_flags: <defaults>
</compile_context>

<pallas_src>
import jax
import jax.numpy as jnp
import numpy as np
from jax.experimental import pallas as pl
from jax.experimental.pallas import tpu as pltpu


def _deconv_matmul_kernel(p_ref, w_ref, b_ref, o_ref):
    """Pure matmul + bias + ReLU body (all relayout hoisted to the wrapper).

    p_ref: (N, K*K*Cin, HW)  im2col patches (built wrapper-side)
    w_ref: (Cout, K*K*Cin)   effective (flipped / in-out-swapped) weight
    b_ref: (Cout, 1)         bias
    o_ref: (N, Cout, HW)     output, spatial dims flattened (lane-dense stores)
    """
    w = w_ref[...]
    bias = b_ref[...].astype(jnp.float32)
    n_batch = o_ref.shape[0]
    for n in range(n_batch):            # tiny static unroll; weight stays resident
        acc = jnp.dot(w, p_ref[n], preferred_element_type=jnp.float32)  # (Cout, HW)
        o_ref[n] = jnp.maximum(acc + bias, 0.0).astype(o_ref.dtype)     # bias + ReLU


def make_deconv_layer(w_pt, b, *, padding=1, stride=1, output_padding=0):
    """Build the layer once (precompute weight/bias transform), return apply(x).

    w_pt: (Cin, Cout, K, K) — PyTorch ConvTranspose2d weight layout; b: (Cout,).
    apply(x): x is (N, Cin, H, W) NCHW -> (N, Cout, H_out, W_out) NCHW.
    """
    assert stride == 1 and output_padding == 0, "kernel covers the default stride=1 path"
    Cin, Cout, K, K2 = w_pt.shape
    assert K == K2
    pe = K - 1 - padding                  # equivalent forward-conv padding
    assert pe >= 0, "padding > kernel_size - 1 unsupported"

    # One-time parameter preprocessing (kept off the per-call path):
    # ConvTranspose(x, w) == Conv(x, flip_spatial(w) with in/out swapped).
    # Row index of w2 = (kh*K + kw)*Cin + ci (must match the patch row order).
    w_eff = jnp.transpose(jnp.flip(w_pt, axis=(2, 3)), (2, 3, 0, 1))      # (K,K,Cin,Cout)
    w2 = jnp.transpose(w_eff.reshape(K * K * Cin, Cout), (1, 0))          # (Cout, K*K*Cin)
    b2 = b.reshape(Cout, 1)

    @jax.jit
    def apply(x):
        N, Cin_x, H, W = x.shape
        assert Cin_x == Cin
        H_out = H - 1 + K - 2 * padding
        W_out = W - 1 + K - 2 * padding
        HW = H_out * W_out

        # Wrapper-side im2col (fused with the zero-pad under jit).
        # patch[n, (kh*K+kw)*Cin + ci, r*W_out + c] = x_pad[n, ci, r+kh, c+kw]
        x_pad = jnp.pad(x, ((0, 0), (0, 0), (pe, pe), (pe, pe)))
        taps = [x_pad[:, :, kh:kh + H_out, kw:kw + W_out]
                for kh in range(K) for kw in range(K)]                     # each (N,Cin,H_out,W_out)
        patch = jnp.stack(taps, axis=1).reshape(N, K * K * Cin, HW)

        out_flat = pl.pallas_call(
            _deconv_matmul_kernel,
            out_shape=jax.ShapeDtypeStruct((N, Cout, HW), x.dtype),
            in_specs=[
                pl.BlockSpec(memory_space=pltpu.MemorySpace.VMEM),   # patch
                pl.BlockSpec(memory_space=pltpu.MemorySpace.VMEM),   # weight
                pl.BlockSpec(memory_space=pltpu.MemorySpace.VMEM),   # bias
            ],
            out_specs=pl.BlockSpec(memory_space=pltpu.MemorySpace.VMEM),
        )(patch, w2, b2)

        # Free (metadata-only) reshape back to NCHW image layout.
        return out_flat.reshape(N, Cout, H_out, W_out)

    return apply


def _reference(x_nchw, w_pt, b, padding=1):
    """Pure-JAX reference for the same math (used only for verification)."""
    K = w_pt.shape[2]
    pe = K - 1 - padding
    w_eff = jnp.transpose(jnp.flip(w_pt, axis=(2, 3)), (2, 3, 0, 1))  # (K,K,Cin,Cout) HWIO
    y = jax.lax.conv_general_dilated(
        x_nchw, w_eff, window_strides=(1, 1),
        padding=((pe, pe), (pe, pe)),
        dimension_numbers=('NCHW', 'HWIO', 'NCHW'))
    return jax.nn.relu(y + b.reshape(1, -1, 1, 1))


if __name__ == "__main__":
    key = jax.random.PRNGKey(0)
    k1, k2, k3 = jax.random.split(key, 3)

    # DeconvLayer(size=[4, 8, 3]) defaults: padding=1, stride=1, ReLU.
    N, Cin, H, W = 2, 4, 16, 16
    Cout, K = 8, 3

    x = jax.random.normal(k1, (N, Cin, H, W), jnp.float32)
    # PyTorch ConvTranspose2d weight layout: (in_channels, out_channels, kH, kW)
    w = jax.random.normal(k2, (Cin, Cout, K, K), jnp.float32) * 0.1
    b = jax.random.normal(k3, (Cout,), jnp.float32) * 0.1

    layer = make_deconv_layer(w, b, padding=1, stride=1, output_padding=0)
    out = jax.block_until_ready(layer(x))

    ref = _reference(x, w, b, padding=1)
    np.testing.assert_allclose(np.asarray(out), np.asarray(ref),
                               rtol=1e-5, atol=1e-5)
    print("KERNEL_OK")
</pallas_src>

<mosaic_0001>
module attributes {stable_mosaic.version = 11 : i64} {
  func.func @_deconv_matmul_kernel(%arg0: memref<2x36x256xf32, #tpu.memory_space<vmem>>, %arg1: memref<8x36xf32, #tpu.memory_space<vmem>>, %arg2: memref<8x1xf32, #tpu.memory_space<vmem>>, %arg3: memref<2x8x256xf32, #tpu.memory_space<vmem>>) attributes {dimension_semantics = [], scalar_prefetch = 0 : i64, scratch_operands = 0 : i64, tpu.core_type = #tpu.core_type<tc>} {
    %c0 = arith.constant 0 : index
    %c0_0 = arith.constant 0 : index
    %0 = vector.load %arg1[%c0, %c0_0] : memref<8x36xf32, #tpu.memory_space<vmem>>, vector<8x36xf32>
    %c0_1 = arith.constant 0 : index
    %c0_2 = arith.constant 0 : index
    %1 = vector.load %arg2[%c0_1, %c0_2] : memref<8x1xf32, #tpu.memory_space<vmem>>, vector<8x1xf32>
    %c0_3 = arith.constant 0 : index
    %c0_4 = arith.constant 0 : index
    %c0_5 = arith.constant 0 : index
    %2 = vector.load %arg0[%c0_3, %c0_4, %c0_5] : memref<2x36x256xf32, #tpu.memory_space<vmem>>, vector<1x36x256xf32>
    %3 = vector.shape_cast %2 : vector<1x36x256xf32> to vector<36x256xf32>
    %cst = arith.constant dense<0.000000e+00> : vector<8x256xf32>
    %4 = tpu.matmul %0, %3, %cst {dimension_numbers = #tpu.dot_dimension_numbers<[1], [0], [0], [1], [0, 0, 1, 1], [], []>} : vector<8x36xf32>, vector<36x256xf32>, vector<8x256xf32> -> vector<8x256xf32>
    %5 = vector.broadcast %1 : vector<8x1xf32> to vector<8x256xf32>
    %6 = arith.addf %4, %5 : vector<8x256xf32>
    %cst_6 = arith.constant 0.000000e+00 : f32
    %7 = vector.broadcast %cst_6 : f32 to vector<8x256xf32>
    %8 = arith.maximumf %6, %7 : vector<8x256xf32>
    %c0_7 = arith.constant 0 : index
    %c0_8 = arith.constant 0 : index
    %c0_9 = arith.constant 0 : index
    %9 = vector.load %arg3[%c0_7, %c0_8, %c0_9] : memref<2x8x256xf32, #tpu.memory_space<vmem>>, vector<1x8x256xf32>
    %10 = vector.shape_cast %9 : vector<1x8x256xf32> to vector<8x256xf32>
    %11 = vector.shape_cast %8 : vector<8x256xf32> to vector<1x8x256xf32>
    tpu.vector_store %arg3[%c0_7, %c0_8, %c0_9], %11 {strides = array<i32>} : memref<2x8x256xf32, #tpu.memory_space<vmem>>, vector<1x8x256xf32>,
    %c1 = arith.constant 1 : index
    %c0_10 = arith.constant 0 : index
    %c0_11 = arith.constant 0 : index
    %12 = vector.load %arg0[%c1, %c0_10, %c0_11] : memref<2x36x256xf32, #tpu.memory_space<vmem>>, vector<1x36x256xf32>
    %13 = vector.shape_cast %12 : vector<1x36x256xf32> to vector<36x256xf32>
    %cst_12 = arith.constant dense<0.000000e+00> : vector<8x256xf32>
    %14 = tpu.matmul %0, %13, %cst_12 {dimension_numbers = #tpu.dot_dimension_numbers<[1], [0], [0], [1], [0, 0, 1, 1], [], []>} : vector<8x36xf32>, vector<36x256xf32>, vector<8x256xf32> -> vector<8x256xf32>
    %15 = vector.broadcast %1 : vector<8x1xf32> to vector<8x256xf32>
    %16 = arith.addf %14, %15 : vector<8x256xf32>
    %cst_13 = arith.constant 0.000000e+00 : f32
    %17 = vector.broadcast %cst_13 : f32 to vector<8x256xf32>
    %18 = arith.maximumf %16, %17 : vector<8x256xf32>
    %c1_14 = arith.constant 1 : index
    %c0_15 = arith.constant 0 : index
    %c0_16 = arith.constant 0 : index
    %19 = vector.load %arg3[%c1_14, %c0_15, %c0_16] : memref<2x8x256xf32, #tpu.memory_space<vmem>>, vector<1x8x256xf32>
    %20 = vector.shape_cast %19 : vector<1x8x256xf32> to vector<8x256xf32>
    %21 = vector.shape_cast %18 : vector<8x256xf32> to vector<1x8x256xf32>
    tpu.vector_store %arg3[%c1_14, %c0_15, %c0_16], %21 {strides = array<i32>} : memref<2x8x256xf32, #tpu.memory_space<vmem>>, vector<1x8x256xf32>,
    return
  }
}

</mosaic_0001>

<bundles_post_ra>
// kernel: apply.1
= control target key start
LH: loop header
LB: loop body
LE: loop exit
PB: predicated region body
PF: predicated region fallthrough
CT: control target
= control target key end

     0   :  { %v251_v3 = vmov 0.0   ;;  %v252_v8 = vmov 0   ;;  %vm35_vm0 = vcmask 1043456   ;;  %vm31_vm1 = vcmask 293888   ;;  %s351_s0 = inlined_call_operand.vmem [shape: f32[2,36,256], index: 0, kind: input, shape index: {}]   ;;  %s352_s2 = inlined_call_operand.vmem [shape: f32[8,1], index: 2, kind: input, shape index: {}]   ;;  %s353_s1 = inlined_call_operand.vmem [shape: f32[8,36], index: 1, kind: input, shape index: {}]   ;;  %s354_s3 = inlined_call_operand.vmem [shape: f32[2,8,256], index: 3, kind: output, shape index: {}]  }
   0x1   :  { %v17_v0 = vld [vmem:[%s351_s0 + $0x8] sm:$0xff]  ;;  %v19_v1 = vld [vmem:[%s351_s0 + $0x18] sm:$0xff]  ;;  %106 = vmatprep.mubr.f32.mxu0 %v251_v3  ;;  %198 = vmatprep.mubr.f32.mxu1 %v251_v3  ;;  %v16_v6 = vld [vmem:[%s351_s0] sm:$0xff] }
   0x2   :  { %v218_v2 = vld [vmem:[%s351_s0 + $0x58] sm:$0xff]  ;;  %v232_v4 = vpack.c.bf16 %v19_v1, %v17_v0  ;;  %v220_v5 = vld [vmem:[%s351_s0 + $0x68] sm:$0xff]  ;;  %v18_v7 = vld [vmem:[%s351_s0 + $0x10] sm:$0xff]  ;;  %250 = vset.pattern.permute.xlu0 %v252_v8 }
   0x3   :  { %v240_v9 = vpack.c.bf16 %v220_v5, %v218_v2  ;;  %v234_v10 = vpack.c.bf16 %v18_v7, %v16_v6  ;;  %v217_v11 = vld [vmem:[%s351_s0 + $0x50] sm:$0xff]  ;;  %v219_v12 = vld [vmem:[%s351_s0 + $0x60] sm:$0xff]  ;;  %v21_v13 = vld [vmem:[%s351_s0 + $0x28] sm:$0xff] }
   0x4   :  { %233 = vmatprep.subr.bf16.mxu0 %v232_v4  ;;  %v242_v14 = vpack.c.bf16 %v219_v12, %v217_v11  ;;  %v23_v15 = vld [vmem:[%s351_s0 + $0x38] sm:$0xff]  ;;  %v224_v17 = vld [vmem:[%s351_s0 + $0x88] sm:$0xff]  ;;  %v20_v20 = vld [vmem:[%s351_s0 + $0x20] sm:$0xff] }
   0x5   :  { %v222_v16 = vld [vmem:[%s351_s0 + $0x78] sm:$0xff]  ;;  %241 = vmatprep.subr.bf16.mxu1 %v240_v9  ;;  %235 = vmatpush1.bf16.msra.mxu0 %v234_v10  ;;  %v236_v18 = vpack.c.bf16 %v23_v15, %v21_v13  ;;  %v22_v21 = vld [vmem:[%s351_s0 + $0x30] sm:$0xff]  ;;  %v223_v24 = vld [vmem:[%s351_s0 + $0x80] sm:$0xff] }
   0x6   :  { %v244_v19 = vpack.c.bf16 %v224_v17, %v222_v16  ;;  %v221_v22 = vld [vmem:[%s351_s0 + $0x70] sm:$0xff]  ;;  %243 = vmatpush1.bf16.msra.mxu1 %v242_v14  ;;  %v238_v23 = vpack.c.bf16 %v22_v21, %v20_v20  ;;  %v25_v26 = vld [vmem:[%s351_s0 + $0x48] sm:$0xf]  ;;  %v226_v27 = vld [vmem:[%s351_s0 + $0x98] sm:$0xf] }
   0x7   :  { %237 = vmatprep.subr.bf16.mxu0 %v236_v18  ;;  %v246_v25 = vpack.c.bf16 %v223_v24, %v221_v22  ;;  %v15_v28 = vld [vmem:[%s352_s2] sm:$0xff]  ;;  %v225_v30 = vld [vmem:[%s351_s0 + $0x90] sm:$0xf] }
   0x8   :  { %245 = vmatprep.subr.bf16.mxu1 %v244_v19  ;;  %28 = vperm.xlu0 %250, %v15_v28   ;;  %v24_v29 = vld [vmem:[%s351_s0 + $0x40] sm:$0xf] }
   0x9   :  { %239 = vmatpush1.bf16.msra.mxu0 %v238_v23  ;;  %v14_v31 = vld [vmem:[%s353_s1] sm:$0xff] }
   0xa   :  { %247 = vmatpush1.bf16.msra.mxu1 %v246_v25  ;;  %214 = vmatprep.subr.msk.mxu0 %vm35_vm0, %v25_v26 }
   0xb   :  { %227 = vmatprep.subr.msk.mxu1 %vm35_vm0, %v226_v27 }
   0xd   :  { %215 = vmatpush1.msk.msra.mxu0 %vm35_vm0, %v24_v29 }
   0xe   :  { %228 = vmatpush1.msk.msra.mxu1 %vm35_vm0, %v225_v30  ;;  %216 = vmatmul.mubr.msk.f32.vlgmr.msra.gmra.mrb[0].mxu0 %vm31_vm1, %v14_v31 }
   0xf   :  { %229 = vmatmul.mubr.msk.f32.vlgmr.msra.gmra.mrb[0].mxu1 %vm31_vm1, %v14_v31 }
  0x87   :  { %v29_v32 = vpop.permute.xlu0 %28 }
  0xe1   :  { %v108_v33 = vpop.f32.mrb[0].mxu0 }
  0xe2   :  { %v109_v34 = vadd.f32 %v108_v33, %v29_v32  ;;  %v200_v35 = vpop.f32.mrb[0].mxu1  ;;  %v110_v36 = vpop.f32.mrb[1].mxu0 }
  0xe3   :  { %v201_v37 = vadd.f32 %v200_v35, %v29_v32  ;;  %v111_v38 = vadd.f32 %v110_v36, %v29_v32  ;;  %v202_v39 = vpop.f32.mrb[1].mxu1 }
  0xe4   :  { %v113_v40 = vmax.f32 %v109_v34, 0.0  ;;  %v203_v41 = vadd.f32 %v202_v39, %v29_v32 }
  0xe5   :  { %v205_v42 = vmax.f32 %v201_v37, 0.0  ;;  %v114_v43 = vmax.f32 %v111_v38, 0.0 }
  0xe6   :  { %115 = vst [vmem:[%s354_s3] sm:$0xff] %v113_v40  ;;  %v206_v44 = vmax.f32 %v203_v41, 0.0 }
  0xe7   :  { %230 = vst [vmem:[%s354_s3 + $0x10] sm:$0xff] %v205_v42  ;;  %116 = vst [vmem:[%s354_s3 + $0x8] sm:$0xff] %v114_v43 }
  0xe8   :  { %231 = vst [vmem:[%s354_s3 + $0x18] sm:$0xff] %v206_v44 }

</bundles_post_ra>
